<compile_context>
chip_gen: v6e
topology: v6e:2x2x1
jax: 0.10.0
libtpu: 0.0.40
codegen_flags: <defaults>
</compile_context>

<pallas_src>
import functools

import jax
import jax.numpy as jnp
from jax.experimental import pallas as pl
from jax.experimental.pallas import tpu as pltpu


def _compose_kernel(x_ref, w_ref, b_ref, o_ref, *, cin):
    # x_ref: (Cin, TL)   lane-dense spatial slab of one batch element
    # w_ref: (Cout, Cin) 1x1-conv weights (constant block -> DMA'd once)
    # b_ref: (Cout, 1)   bias column      (constant block -> DMA'd once)
    # o_ref: (Cout, TL)  output slab
    x = x_ref[...].astype(jnp.float32)
    w = w_ref[...].astype(jnp.float32)

    # "first": 1x1 conv == tiny channel contraction, done as Cin broadcast-FMAs
    # on the VPU (MXU would run at <1% utilization for K=4, N=8).
    acc = b_ref[...].astype(jnp.float32)              # (Cout, 1), lane-broadcast
    for ci in range(cin):
        acc = acc + w[:, ci:ci + 1] * x[ci:ci + 1, :]  # (Cout,1)*(1,TL)->(Cout,TL)

    # "second": ReLU on the VPU.
    o_ref[...] = jnp.maximum(acc, 0.0).astype(o_ref.dtype)


def custom_compose_forward(x_nchw, w_oihw, bias, *, max_lane_tile=16384):
    """y = ReLU(Conv2d_1x1(x)) with x in NCHW; returns NCHW.

    x_nchw: [B, Cin, H, W]   w_oihw: [Cout, Cin, 1, 1]   bias: [Cout]
    """
    B, Cin, H, W = x_nchw.shape
    Cout = w_oihw.shape[0]
    HW = H * W

    # Free views of contiguous NCHW data -- no transpose passes through HBM.
    x3 = x_nchw.reshape(B, Cin, HW)
    w2 = w_oihw.reshape(Cout, Cin)
    b2 = bias.reshape(Cout, 1)

    # Lane-dense tiling of the spatial axis: full extent if small, otherwise a
    # multiple-of-128 tile (ragged edge block stores are masked by Pallas).
    TL = HW if HW <= max_lane_tile else max_lane_tile
    grid = (B, pl.cdiv(HW, TL))

    kernel = functools.partial(_compose_kernel, cin=Cin)

    itemsize = x3.dtype.itemsize
    cost = pl.CostEstimate(
        flops=2 * B * HW * Cin * Cout,
        transcendentals=0,
        bytes_accessed=(B * Cin * HW + B * Cout * HW) * itemsize
        + (Cout * Cin + Cout) * 4,
    )

    out3 = pl.pallas_call(
        kernel,
        out_shape=jax.ShapeDtypeStruct((B, Cout, HW), x_nchw.dtype),
        grid_spec=pl.GridSpec(
            grid=grid,
            in_specs=[
                # batch dim squeezed out of the kernel ref (size-1 block)
                pl.BlockSpec((None, Cin, TL), lambda b, j: (b, 0, j)),
                pl.BlockSpec((Cout, Cin), lambda b, j: (0, 0)),
                pl.BlockSpec((Cout, 1), lambda b, j: (0, 0)),
            ],
            out_specs=pl.BlockSpec((None, Cout, TL), lambda b, j: (b, 0, j)),
        ),
        compiler_params=pltpu.CompilerParams(
            dimension_semantics=("parallel", "parallel"),
        ),
        cost_estimate=cost,
    )(x3, w2, b2)

    return out3.reshape(B, Cout, H, W)


if __name__ == "__main__":
    key = jax.random.PRNGKey(0)
    k_x, k_w, k_b = jax.random.split(key, 3)

    B, Cin, H, W = 2, 4, 16, 16
    Cout = 8

    # deterministic synthetic inputs / parameters (no checkpoint load)
    x = jax.random.normal(k_x, (B, Cin, H, W), dtype=jnp.float32)
    # PyTorch Conv2d weight layout: [Cout, Cin, 1, 1]
    w_torch = jax.random.normal(k_w, (Cout, Cin, 1, 1), dtype=jnp.float32) * 0.1
    b = jax.random.normal(k_b, (Cout,), dtype=jnp.float32) * 0.1

    y = custom_compose_forward(x, w_torch, b)
    y = jax.block_until_ready(y)

    # reference in plain JAX (same math: 1x1 conv + bias + relu), NCHW layout
    w2 = w_torch[:, :, 0, 0]
    ref = jnp.maximum(
        jnp.einsum("oc,bchw->bohw", w2, x) + b[None, :, None, None], 0.0
    )
    assert y.shape == (B, Cout, H, W)
    assert jnp.allclose(y, ref, atol=1e-5, rtol=1e-5)

    print("KERNEL_OK")
</pallas_src>

<mosaic_0001>
module attributes {stable_mosaic.version = 11 : i64} {
  func.func @_compose_kernel(%arg0: i32, %arg1: i32, %arg2: memref<1x4x256xf32, #tpu.memory_space<vmem>>, %arg3: memref<8x4xf32, #tpu.memory_space<vmem>>, %arg4: memref<8x1xf32, #tpu.memory_space<vmem>>, %arg5: memref<1x8x256xf32, #tpu.memory_space<vmem>>) attributes {dimension_semantics = [#tpu.dimension_semantics<parallel>, #tpu.dimension_semantics<parallel>], iteration_bounds = array<i64: 2, 1>, scalar_prefetch = 0 : i64, scratch_operands = 0 : i64, tpu.core_type = #tpu.core_type<tc>, window_params = [{transform_indices = @transform_0, window_bounds = array<i64: 1, 4, 256>}, {pipeline_mode = #tpu.pipeline_mode<synchronous>, transform_indices = @transform_1, window_bounds = array<i64: 8, 4>}, {pipeline_mode = #tpu.pipeline_mode<synchronous>, transform_indices = @transform_2, window_bounds = array<i64: 8, 1>}, {transform_indices = @transform_3, window_bounds = array<i64: 1, 8, 256>}]} {
    %c0 = arith.constant 0 : index
    %c0_0 = arith.constant 0 : index
    %c0_1 = arith.constant 0 : index
    %0 = vector.load %arg2[%c0, %c0_0, %c0_1] : memref<1x4x256xf32, #tpu.memory_space<vmem>>, vector<1x4x256xf32>
    %1 = vector.shape_cast %0 : vector<1x4x256xf32> to vector<4x256xf32>
    %c0_2 = arith.constant 0 : index
    %c0_3 = arith.constant 0 : index
    %2 = vector.load %arg3[%c0_2, %c0_3] : memref<8x4xf32, #tpu.memory_space<vmem>>, vector<8x4xf32>
    %c0_4 = arith.constant 0 : index
    %c0_5 = arith.constant 0 : index
    %3 = vector.load %arg4[%c0_4, %c0_5] : memref<8x1xf32, #tpu.memory_space<vmem>>, vector<8x1xf32>
    %4 = vector.extract_strided_slice %2 {offsets = [0, 0], sizes = [8, 1], strides = [1, 1]} : vector<8x4xf32> to vector<8x1xf32>
    %5 = vector.extract_strided_slice %1 {offsets = [0, 0], sizes = [1, 256], strides = [1, 1]} : vector<4x256xf32> to vector<1x256xf32>
    %6 = vector.broadcast %4 : vector<8x1xf32> to vector<8x256xf32>
    %7 = vector.broadcast %5 : vector<1x256xf32> to vector<8x256xf32>
    %8 = arith.mulf %6, %7 : vector<8x256xf32>
    %9 = vector.broadcast %3 : vector<8x1xf32> to vector<8x256xf32>
    %10 = arith.addf %9, %8 : vector<8x256xf32>
    %11 = vector.extract_strided_slice %2 {offsets = [0, 1], sizes = [8, 1], strides = [1, 1]} : vector<8x4xf32> to vector<8x1xf32>
    %12 = vector.extract_strided_slice %1 {offsets = [1, 0], sizes = [1, 256], strides = [1, 1]} : vector<4x256xf32> to vector<1x256xf32>
    %13 = vector.broadcast %11 : vector<8x1xf32> to vector<8x256xf32>
    %14 = vector.broadcast %12 : vector<1x256xf32> to vector<8x256xf32>
    %15 = arith.mulf %13, %14 : vector<8x256xf32>
    %16 = arith.addf %10, %15 : vector<8x256xf32>
    %17 = vector.extract_strided_slice %2 {offsets = [0, 2], sizes = [8, 1], strides = [1, 1]} : vector<8x4xf32> to vector<8x1xf32>
    %18 = vector.extract_strided_slice %1 {offsets = [2, 0], sizes = [1, 256], strides = [1, 1]} : vector<4x256xf32> to vector<1x256xf32>
    %19 = vector.broadcast %17 : vector<8x1xf32> to vector<8x256xf32>
    %20 = vector.broadcast %18 : vector<1x256xf32> to vector<8x256xf32>
    %21 = arith.mulf %19, %20 : vector<8x256xf32>
    %22 = arith.addf %16, %21 : vector<8x256xf32>
    %23 = vector.extract_strided_slice %2 {offsets = [0, 3], sizes = [8, 1], strides = [1, 1]} : vector<8x4xf32> to vector<8x1xf32>
    %24 = vector.extract_strided_slice %1 {offsets = [3, 0], sizes = [1, 256], strides = [1, 1]} : vector<4x256xf32> to vector<1x256xf32>
    %25 = vector.broadcast %23 : vector<8x1xf32> to vector<8x256xf32>
    %26 = vector.broadcast %24 : vector<1x256xf32> to vector<8x256xf32>
    %27 = arith.mulf %25, %26 : vector<8x256xf32>
    %28 = arith.addf %22, %27 : vector<8x256xf32>
    %cst = arith.constant 0.000000e+00 : f32
    %29 = vector.broadcast %cst : f32 to vector<8x256xf32>
    %30 = arith.maximumf %28, %29 : vector<8x256xf32>
    %c0_6 = arith.constant 0 : index
    %c0_7 = arith.constant 0 : index
    %c0_8 = arith.constant 0 : index
    %31 = vector.load %arg5[%c0_6, %c0_7, %c0_8] : memref<1x8x256xf32, #tpu.memory_space<vmem>>, vector<1x8x256xf32>
    %32 = vector.shape_cast %31 : vector<1x8x256xf32> to vector<8x256xf32>
    %33 = vector.shape_cast %30 : vector<8x256xf32> to vector<1x8x256xf32>
    tpu.vector_store %arg5[%c0_6, %c0_7, %c0_8], %33 {strides = array<i32>} : memref<1x8x256xf32, #tpu.memory_space<vmem>>, vector<1x8x256xf32>,
    return
  }
  func.func @transform_0(%arg0: i32, %arg1: i32) -> (i32, i32, i32) {
    %c0_i32 = arith.constant 0 : i32
    %c0_i32_0 = arith.constant 0 : i32
    return %arg0, %c0_i32, %arg1 : i32, i32, i32
  }
  func.func @transform_1(%arg0: i32, %arg1: i32) -> (i32, i32) {
    %c0_i32 = arith.constant 0 : i32
    %c0_i32_0 = arith.constant 0 : i32
    %c0_i32_1 = arith.constant 0 : i32
    return %c0_i32, %c0_i32_0 : i32, i32
  }
  func.func @transform_2(%arg0: i32, %arg1: i32) -> (i32, i32) {
    %c0_i32 = arith.constant 0 : i32
    %c0_i32_0 = arith.constant 0 : i32
    %c0_i32_1 = arith.constant 0 : i32
    return %c0_i32, %c0_i32_0 : i32, i32
  }
  func.func @transform_3(%arg0: i32, %arg1: i32) -> (i32, i32, i32) {
    %c0_i32 = arith.constant 0 : i32
    %c0_i32_0 = arith.constant 0 : i32
    return %arg0, %c0_i32, %arg1 : i32, i32, i32
  }
}

</mosaic_0001>

<bundles_post_ra>
// kernel: tpu_custom_call.1
= control target key start
LH: loop header
LB: loop body
LE: loop exit
PB: predicated region body
PF: predicated region fallthrough
CT: control target
= control target key end

     0   :  { %8 = vsyncpa [#allocation3], 0  ;;  %s707_s0 = inlined_call_operand.vmem [shape: f32[2,4,256], index: 0, kind: input, shape index: {}]   ;;  %s708_s1 = inlined_call_operand.vmem [shape: f32[8,4], index: 1, kind: input, shape index: {}]   ;;  %s709_s2 = inlined_call_operand.vmem [shape: f32[8,1], index: 2, kind: input, shape index: {}]   ;;  %s710_s3 = inlined_call_operand.hbm [shape: f32[2,8,256], index: 3, kind: output, shape index: {}]  }
   0x1   :  { %10 = vsyncpa [#allocation3 + $0x1], 0  ;;  %s592_s12 = smov 0   ;;  %s594_s13 = smov 0  }
   0x2   :  { %s596_s14 = smov 0   ;;  %s598_s15 = smov 0  }
   0x3   :  { %s600_s16 = smov 0   ;;  %s602_s17 = smov 0  }
   0x4 LB: > { %s411_s18 = sadd.s32 4294967295, %s565_s17   ;;  %s412_s19 = sadd.s32 4294967294, %s565_s17   ;;  %s565_s17 = sphi %s602_s17, %s16_s17   ;;  %s561_s16 = sphi %s600_s16, %s717_s16   ;;  %s557_s15 = sphi %s598_s15, %s716_s15   ;;  %s553_s14 = sphi %s596_s14, %s715_s14   ;;  %s549_s13 = sphi %s594_s13, %s714_s13   ;;  %s545_s12 = sphi %s592_s12, %s713_s12  }
   0x5   : > { %s28_s20 = sadd.s32 1, %s561_s16  ;;  %s107_s21 = sadd.s32 1, %s553_s14 }
   0x6   : > { %p30_p0 = scmp.ge.s32.totalorder %s28_s20, 2  ;;  %p117_p1 = scmp.ne.s32.totalorder %s553_s14, %s549_s13 }
   0x7   : > { %p118_p2 = scmp.eq.s32.totalorder %s411_s18, 1  ;;  %p123_p3 = scmp.ne.s32.totalorder %s549_s13, %s545_s12 }
   0x8   : > { %s719_s20 = smov (%p30_p0, %s28_s20), 0  ;;  %p124_p5 = scmp.eq.s32.totalorder %s412_s19, 1 }
   0x9   : > { %p632_p4 = por %p118_p2, %p117_p1  ;;  %s102_s23 = ssub.s32 %s561_s16, %s719_s20 }
   0xa   : > { %p415_p6 = scmp.ge.s32.totalorder %s565_s17, 1  ;;  %p105_p7 = scmp.eq.s32.totalorder %s102_s23, 0 }
   0xb   : > { %p639_p8 = por %p124_p5, %p123_p3  ;;  %p161_p9 = scmp.lt.s32.totalorder %s565_s17, 3 }
   0xc   : > { %s645_s25 = scalar_select %p105_p7, %s553_s14, %s107_s21  }
   0xd   : > { %p162_p10 = pnand %p415_p6, %p161_p9 }
   0xe   : > { %p190_p11 = scmp.lt.s32.totalorder (!%p162_p10), %s557_s15, 1  ;;  %s186_s8 = sand.u32 (!%p162_p10), 1, %s549_s13  }
   0xf   : > { %165 = sbr.rel (%p162_p10) target bundleno = 174 (0xae), region = 32  ;;  %s416_s9 = sshll.u32 (!%p162_p10), %s186_s8, 4 }
  0x10   : > { %s425_s10 = sshll.u32 (!%p162_p10), %s557_s15, 8  ;;  %s188_s11 = scalar_lea.vmem (!%p162_p10), [#allocation2], %s416_s9 }
  0x11   : > { %s335_s18 = sshll.u32 (!%p162_p10), %s188_s11, 4  ;;  %s665_s23 = scalar_lea.hbm (!%p162_p10), %s710_s3, %s425_s10  ;;  %s336_s18 = int_to_ptr.vmem [resolvable:$true] %s335_s18 }
  0x12   : > { %s319_s26 = scalar_lea.sflag (!%p162_p10), [#allocation3], %s186_s8  ;;  %s489_s27 = scalar_lea.vmem (!%p162_p10), %s336_s18, 256 }
  0x13   : > { %p490_p12 = scmp.ne.s32.totalorder (!%p162_p10), %s336_s18, %s489_s27 }
  0x14   : > { %v201_v0 = vld [vmem:[%s708_s1] sm:$0xff]  ;;  %v567_v1 = vmov 0   ;;  %v568_v2 = vmov 1   ;;  %v569_v4 = vmov 2   ;;  %v570_v5 = vmov 3   ;;  %s191_s30 = scalar_select %p190_p11, %s557_s15, 1 }
  0x15   : > { %485 = vset.pattern.permute.xlu0 %v567_v1  ;;  %486 = vset.pattern.permute.xlu1 %v568_v2  ;;  %v202_v3 = vld [vmem:[%s709_s2] sm:$0xff]  ;;  %v209_v6 = vlaneseq  ;;  %p491_p13 = pnand %p490_p12, %p632_p4  ;;  %s571_s15 = smov [#allocation2]  }
  0x16   : > { %205 = vperm.xlu0 %485, %v201_v0   ;;  %237 = vperm.xlu1 %486, %v201_v0   ;;  %s424_s4 = sshll.u32 %s191_s30, 3  ;;  %s493_s28 = sshll.u32 %s571_s15, 4  ;;  %s494_s28 = int_to_ptr.vmem [resolvable:$false] %s493_s28 }
  0x17   : > { %v210_v7 = vshrl.u32 %v209_v6, 7  ;;  %s197_s7 = scalar_lea.vmem %s707_s0, %s424_s4  ;;  %p492_p0 = pneg %p491_p13 }
  0x18   : > { %v200_v10 = vld [vmem:[%s197_s7] sm:$0xff]  ;;  %s495_s29 = scalar_lea.vmem %s494_s28, 512  ;;  %p496_p1 = scmp.lt.s32.totalorder %s336_s18, %s494_s28 }
  0x19   : > { %v211_v8 = vsub.s32 0, %v210_v7  ;;  %v215_v9 = vsub.s32 4, %v210_v7  ;;  %v242_v11 = vsub.s32 1, %v210_v7  ;;  %v246_v12 = vsub.s32 5, %v210_v7  ;;  %p497_p2 = scmp.lt.s32.totalorder %s495_s29, %s489_s27 }
  0x1a   : > { %231 = vperm.xlu0 %485, %v202_v3   ;;  %487 = vset.pattern.permute.xlu1 %v569_v4  ;;  %v268_v13 = vsub.s32 2, %v210_v7  ;;  %v272_v14 = vsub.s32 6, %v210_v7  ;;  %v294_v21 = vsub.s32 3, %v210_v7  ;;  %v298_v22 = vsub.s32 7, %v210_v7 }
  0x1b   : > { %263 = vperm.xlu1 %487, %v201_v0   ;;  %v212_v15 = vrot.slane %v200_v10, %v211_v8  ;;  %v216_v16 = vrot.slane %v200_v10, %v215_v9  ;;  %v243_v17 = vrot.slane %v200_v10, %v242_v11  ;;  %v247_v18 = vrot.slane %v200_v10, %v246_v12  ;;  %p498_p3 = por %p497_p2, %p496_p1 }
  0x1c   : > { %v269_v19 = vrot.slane %v200_v10, %v268_v13  ;;  %v273_v20 = vrot.slane %v200_v10, %v272_v14  ;;  %v295_v31 = vrot.slane %v200_v10, %v294_v21  ;;  %v299_v32 = vrot.slane %v200_v10, %v298_v22 }
  0x1d   : > { %v222_v23 = vrot.slane %v212_v15, %v211_v8  ;;  %v226_v24 = vrot.slane %v216_v16, %v211_v8  ;;  %v253_v27 = vrot.slane %v243_v17, %v242_v11  ;;  %v257_v28 = vrot.slane %v247_v18, %v242_v11  ;;  %p499_p5 = pnand %p498_p3, %p492_p0 }
  0x1e   : > { %488 = vset.pattern.permute.xlu0 %v570_v5  ;;  %v279_v29 = vrot.slane %v269_v19, %v268_v13  ;;  %v283_v30 = vrot.slane %v273_v20, %v268_v13  ;;  %v305_v43 = vrot.slane %v295_v31, %v294_v21  ;;  %v309_v44 = vrot.slane %v299_v32, %v294_v21 }
  0x1f   : > { %289 = vperm.xlu0 %488, %v201_v0  }
  0x91   : > { %v206_v25 = vpop.permute.xlu0 %205  ;;  %v238_v26 = vpop.permute.xlu1 %237 }
  0x92   : > { %v227_v33 = vmul.f32 %v222_v23, %v206_v25  ;;  %v228_v34 = vmul.f32 %v226_v24, %v206_v25  ;;  %v258_v36 = vmul.f32 %v253_v27, %v238_v26  ;;  %v259_v37 = vmul.f32 %v257_v28, %v238_v26 }
  0x95   : > { %v232_v35 = vpop.permute.xlu0 %231 }
  0x96   : > { %v234_v38 = vadd.f32 %v232_v35, %v227_v33  ;;  %v235_v39 = vadd.f32 %v232_v35, %v228_v34  ;;  %v264_v40 = vpop.permute.xlu1 %263 }
  0x97   : > { %v284_v41 = vmul.f32 %v279_v29, %v264_v40  ;;  %v285_v42 = vmul.f32 %v283_v30, %v264_v40 }
  0x98   : > { %v260_v45 = vadd.f32 %v258_v36, %v234_v38  ;;  %v261_v46 = vadd.f32 %v259_v37, %v235_v39 }
  0x9a   : > { %v286_v47 = vadd.f32 %v284_v41, %v260_v45  ;;  %v287_v48 = vadd.f32 %v285_v42, %v261_v46  ;;  %v290_v49 = vpop.permute.xlu0 %289 }
  0x9b   : > { %v310_v50 = vmul.f32 %v305_v43, %v290_v49  ;;  %v311_v51 = vmul.f32 %v309_v44, %v290_v49 }
  0x9d   : > { %v312_v52 = vadd.f32 %v310_v50, %v286_v47  ;;  %v313_v53 = vadd.f32 %v311_v51, %v287_v48 }
  0x9f   : > { %v314_v54 = vmax.f32 %v312_v52, 0.0  ;;  %v315_v55 = vmax.f32 %v313_v53, 0.0 }
  0xa1   : > { %316 = vst [vmem:[%s188_s11] sm:$0xff] %v314_v54  ;;  %317 = vst [vmem:[%s188_s11 + $0x8] sm:$0xff] %v315_v55 }
  0xa2   : > { %502 = shalt.err (!%p499_p5)
}
  0xa3   : > { %s503_s30 = scalar_lea.hbm %s665_s23, 256  ;;  %s507_s6 = scalar_lea.hbm %s710_s3, 512 }
  0xa4   : > { %p504_p6 = scmp.ne.s32.totalorder %s665_s23, %s503_s30  ;;  %p508_p10 = scmp.lt.s32.totalorder %s665_s23, %s710_s3 }
  0xa5   : > { %p509_p11 = scmp.lt.s32.totalorder %s507_s6, %s503_s30 }
  0xa6   : > { %p505_p7 = pnand %p504_p6, %p632_p4 }
  0xa7   : > { %p510_p12 = por %p509_p11, %p508_p10 }
  0xa8   : > { %p506_p9 = pneg %p505_p7 }
  0xaa   : > { %p511_p13 = pnand %p510_p12, %p506_p9 }
  0xac   : > { %514 = shalt.err (!%p511_p13)
}
  0xad   : > { %426 = dma.vmem_to_hbm [thread:$0]  (%p632_p4), %s336_s18, 256, %s665_s23, %s319_s26  }
  0xae PF: > { %p432_p0 = scmp.ge.s32.totalorder %s565_s17, 2  ;;  %s347_s9 = sand.u32 1, %s545_s12  }
  0xaf   : > { %s348_s10 = scalar_lea.sflag [#allocation3], %s347_s9 }
  0xb0   : > { %p429_p1 = pnand %p432_p0, %p639_p8 }
  0xb2   : > { %p430_p2 = pneg %p429_p1 }
  0xb4   : > { %540 = dma.done.wait (%p430_p2), %s348_s10, 256  }
  0xb5   : > { %542 = vsyncadd (%p430_p2), %s348_s10, 4294967040  ;;  %s16_s17 = sadd.s32 1, %s565_s17   ;;  %s713_s12 = smov %s549_s13 }
  0xb6   : > { %p13_p3 = scmp.ge.s32.totalorder %s16_s17, 4   ;;  %s714_s13 = smov %s553_s14 }
  0xb7   : > { %s715_s14 = smov %s645_s25  ;;  %s716_s15 = smov %s561_s16 }
  0xb8   : > { %s717_s16 = smov %s719_s20  ;;  %15 = sbr.rel (!%p13_p3) target bundleno = 4 (0x4), region = 67 }
  0xbd   :  { %353 = vsyncpa [#allocation3], 1 }
  0xbe   :  { %355 = vsyncpa [#allocation3 + $0x1], 1 }

</bundles_post_ra>
